<compile_context>
chip_gen: v5e
topology: v5e:2x2
jax: 0.10.0
libtpu: 0.0.40
codegen_flags: <defaults>
</compile_context>

<pallas_src>
import jax
import jax.numpy as jnp
from jax.experimental import pallas as pl
from jax.experimental.pallas import tpu as pltpu


def decoder_kernel(z_ref, w_ref, b_ref, o_ref):
    # MXU matmul with f32 accumulation, VPU bias add, EUP exp, cast on store.
    y = jnp.dot(z_ref[...], w_ref[...], preferred_element_type=jnp.float32)
    o_ref[...] = jnp.exp(y + b_ref[...]).astype(o_ref.dtype)


def _round_up(x, m):
    return (x + m - 1) // m * m


def _vmem_capacity_bytes():
    """Per-core VMEM capacity (64 MiB on v7x, 128 MiB on v5e/v6e)."""
    try:
        cap = getattr(pltpu.get_tpu_info(), "vmem_capacity_bytes", None)
        if cap:
            return int(cap)
    except Exception:
        pass
    return 64 * 1024 * 1024  # conservative (v7x per-TC) fallback


def _footprint_bytes(tm, tn, latent, in_bytes, out_bytes):
    # Pallas double-buffers every auto-pipelined operand (z, W, b, out).
    return 2 * (tm * latent * in_bytes + latent * tn * in_bytes
                + tn * 4 + tm * tn * out_bytes)


def decoder_forward(z, w_t, b, *, tm_max=512, tn_max=2048, out_dtype=jnp.float32):
    """exp(z @ w_t + b) via a tiled Pallas TPU kernel.

    z   : (B, L)          activations (f32 or bf16)
    w_t : (L, O)          transposed nn.Linear weight (stored persistently in its dtype)
    b   : (O,) or (1, O)  bias (kept f32; added after f32 accumulation)
    returns (B, O) in `out_dtype`.
    """
    B, L = z.shape
    O = w_t.shape[1]
    b = jnp.asarray(b, jnp.float32).reshape(1, O)
    if z.dtype != w_t.dtype:
        # (B, L) is the small operand; weights should already be pre-cast at init.
        z = z.astype(w_t.dtype)

    in_bytes = jnp.dtype(w_t.dtype).itemsize
    out_bytes = jnp.dtype(out_dtype).itemsize

    # ---- Tile selection (no array padding: ragged last blocks are masked) ----
    # Lane (output) tile: lane-dense multiple of 128; full round_up(O, 128) when
    # it fits so W is fetched exactly once and stores stay unmasked except the
    # ragged tail.
    TN = min(tn_max, _round_up(O, 128))
    n_j = pl.cdiv(O, TN)
    # Batch tile: multiple of 8; aim for ~8 total grid steps so the DMA pipeline
    # has work to overlap (and both v7x TensorCores stay busy), floor of 128
    # rows (or the whole batch) so per-step overhead stays amortized.
    tm_steps = _round_up(pl.cdiv(B, max(1, pl.cdiv(8, n_j))), 8)
    tm_cap = min(tm_max, _round_up(B, 8))
    TM = max(min(tm_cap, tm_steps), min(128, tm_cap))

    # ---- Generation-aware VMEM budget (v7x: 64 MiB/TC; v5e/v6e: 128 MiB) -----
    vmem_cap = _vmem_capacity_bytes()
    budget = int(0.45 * vmem_cap)
    while (_footprint_bytes(TM, TN, L, in_bytes, out_bytes) > budget
           and (TM > 8 or TN > 128)):
        if TN >= 256 and (TN >= TM or TM <= 8):
            TN = max(128, (TN // 2 // 128) * 128)
        else:
            TM = max(8, (TM // 2 // 8) * 8)

    n_i = pl.cdiv(B, TM)   # batch tiles  (fast axis -> W slab stays VMEM-resident)
    n_j = pl.cdiv(O, TN)   # output tiles (slow axis -> each W slab DMA'd once)

    footprint = _footprint_bytes(TM, TN, L, in_bytes, out_bytes)
    vmem_limit = int(min(0.7 * vmem_cap, max(32 * 1024 * 1024, 2 * footprint)))

    return pl.pallas_call(
        decoder_kernel,
        out_shape=jax.ShapeDtypeStruct((B, O), out_dtype),
        grid=(n_j, n_i),
        in_specs=[
            pl.BlockSpec((TM, L), lambda j, i: (i, 0)),   # z: streams over batch
            pl.BlockSpec((L, TN), lambda j, i: (0, j)),   # W: resident across the M sweep
            pl.BlockSpec((1, TN), lambda j, i: (0, j)),   # b: resident across the M sweep
        ],
        out_specs=pl.BlockSpec((TM, TN), lambda j, i: (i, j)),
        compiler_params=pltpu.CompilerParams(
            dimension_semantics=("parallel", "parallel"),   # no reduction axis
            vmem_limit_bytes=vmem_limit,
        ),
    )(z, w_t, b)
    # TODO(synk): if latent_dim grows into the thousands, add a trailing K grid
    # axis ("arbitrary") with an f32 VMEM accumulator instead of keeping the
    # full (L, TN) weight slab resident.


def init_decoder_params(key, latent_dim, output_dim, dtype=jnp.float32):
    """nn.Linear-style init (uniform +/- 1/sqrt(fan_in)); weight stored transposed.

    Weights are cast to their storage dtype ONCE here, never per forward call.
    """
    kw, kb = jax.random.split(key)
    bound = 1.0 / jnp.sqrt(jnp.float32(latent_dim))
    # PyTorch weight shape is (output_dim, latent_dim); store transposed for the kernel.
    w = jax.random.uniform(kw, (output_dim, latent_dim), jnp.float32, -bound, bound)
    b = jax.random.uniform(kb, (output_dim,), jnp.float32, -bound, bound)
    return w.T.astype(dtype), b.reshape(1, output_dim)


if __name__ == "__main__":
    key = jax.random.PRNGKey(0)
    k1, k2, k3, k4, k5, k6 = jax.random.split(key, 6)

    # --- Small case matching the module's tiny config (f32, exact check) -----
    B, latent_dim, output_dim = 8, 32, 128
    w_t, b = init_decoder_params(k1, latent_dim, output_dim)
    z = jax.random.normal(k2, (B, latent_dim), jnp.float32)
    out = jax.block_until_ready(decoder_forward(z, w_t, b))
    ref = jnp.exp(z @ w_t + b)
    assert out.shape == (B, output_dim) and out.dtype == jnp.float32
    assert jnp.allclose(out, ref, rtol=1e-5, atol=1e-5)

    # --- Ragged case: masked last lane block, no padding / slicing copies ----
    B2, L2, O2 = 1000, 64, 1100
    w2_t, b2 = init_decoder_params(k3, L2, O2)
    z2 = jax.random.normal(k4, (B2, L2), jnp.float32)
    out2 = jax.block_until_ready(decoder_forward(z2, w2_t, b2))
    ref2 = jnp.exp(z2 @ w2_t + b2)
    assert out2.shape == (B2, O2)
    assert jnp.allclose(out2, ref2, rtol=1e-3, atol=1e-3)

    # --- bf16 weights stored persistently + bf16 output (halves HBM write) ---
    B3, L3, O3 = 512, 64, 1280
    w3_t, b3 = init_decoder_params(k5, L3, O3, dtype=jnp.bfloat16)
    z3 = jax.random.normal(k6, (B3, L3), jnp.float32).astype(jnp.bfloat16)
    out3 = jax.block_until_ready(
        decoder_forward(z3, w3_t, b3, out_dtype=jnp.bfloat16))
    ref3 = jnp.exp(z3.astype(jnp.float32) @ w3_t.astype(jnp.float32) + b3)
    assert out3.shape == (B3, O3) and out3.dtype == jnp.bfloat16
    assert jnp.allclose(out3.astype(jnp.float32), ref3, rtol=1e-1, atol=1e-1)

    print("KERNEL_OK")
</pallas_src>

<mosaic_0001>
module attributes {stable_mosaic.version = 11 : i64} {
  func.func @decoder_kernel(%arg0: i32, %arg1: i32, %arg2: memref<8x32xf32, #tpu.memory_space<vmem>>, %arg3: memref<32x128xf32, #tpu.memory_space<vmem>>, %arg4: memref<1x128xf32, #tpu.memory_space<vmem>>, %arg5: memref<8x128xf32, #tpu.memory_space<vmem>>) attributes {dimension_semantics = [#tpu.dimension_semantics<parallel>, #tpu.dimension_semantics<parallel>], iteration_bounds = array<i64: 1, 1>, scalar_prefetch = 0 : i64, scratch_operands = 0 : i64, tpu.core_type = #tpu.core_type<tc>, window_params = [{transform_indices = @transform_0, window_bounds = array<i64: 8, 32>}, {transform_indices = @transform_1, window_bounds = array<i64: 32, 128>}, {transform_indices = @transform_2, window_bounds = array<i64: 1, 128>}, {transform_indices = @transform_3, window_bounds = array<i64: 8, 128>}]} {
    %c0 = arith.constant 0 : index
    %c0_0 = arith.constant 0 : index
    %0 = vector.load %arg2[%c0, %c0_0] : memref<8x32xf32, #tpu.memory_space<vmem>>, vector<8x32xf32>
    %c0_1 = arith.constant 0 : index
    %c0_2 = arith.constant 0 : index
    %1 = vector.load %arg3[%c0_1, %c0_2] : memref<32x128xf32, #tpu.memory_space<vmem>>, vector<32x128xf32>
    %cst = arith.constant dense<0.000000e+00> : vector<8x128xf32>
    %2 = tpu.matmul %0, %1, %cst {dimension_numbers = #tpu.dot_dimension_numbers<[1], [0], [0], [1], [0, 0, 1, 1], [], []>} : vector<8x32xf32>, vector<32x128xf32>, vector<8x128xf32> -> vector<8x128xf32>
    %c0_3 = arith.constant 0 : index
    %c0_4 = arith.constant 0 : index
    %3 = vector.load %arg4[%c0_3, %c0_4] : memref<1x128xf32, #tpu.memory_space<vmem>>, vector<1x128xf32>
    %4 = vector.broadcast %3 : vector<1x128xf32> to vector<8x128xf32>
    %5 = arith.addf %2, %4 : vector<8x128xf32>
    %6 = math.exp %5 : vector<8x128xf32>
    %c0_5 = arith.constant 0 : index
    %c0_6 = arith.constant 0 : index
    %7 = vector.load %arg5[%c0_5, %c0_6] : memref<8x128xf32, #tpu.memory_space<vmem>>, vector<8x128xf32>
    tpu.vector_store %arg5[%c0_5, %c0_6], %6 {strides = array<i32>} : memref<8x128xf32, #tpu.memory_space<vmem>>, vector<8x128xf32>,
    return
  }
  func.func @transform_0(%arg0: i32, %arg1: i32) -> (i32, i32) {
    %c0_i32 = arith.constant 0 : i32
    %c0_i32_0 = arith.constant 0 : i32
    return %arg1, %c0_i32 : i32, i32
  }
  func.func @transform_1(%arg0: i32, %arg1: i32) -> (i32, i32) {
    %c0_i32 = arith.constant 0 : i32
    %c0_i32_0 = arith.constant 0 : i32
    return %c0_i32, %arg0 : i32, i32
  }
  func.func @transform_2(%arg0: i32, %arg1: i32) -> (i32, i32) {
    %c0_i32 = arith.constant 0 : i32
    %c0_i32_0 = arith.constant 0 : i32
    return %c0_i32, %arg0 : i32, i32
  }
  func.func @transform_3(%arg0: i32, %arg1: i32) -> (i32, i32) {
    %c0_i32 = arith.constant 0 : i32
    return %arg1, %arg0 : i32, i32
  }
}

</mosaic_0001>

<bundles_post_ra>
// kernel: tpu_custom_call.1
= control target key start
LH: loop header
LB: loop body
LE: loop exit
PB: predicated region body
PF: predicated region fallthrough
CT: control target
= control target key end

     0   :  { %8 = vsyncpa [#allocation3], 0  ;;  %s223_s0 = inlined_call_operand.hbm [shape: f32[8,32], index: 0, kind: input, shape index: {}]   ;;  %s224_s1 = inlined_call_operand.hbm [shape: f32[32,128], index: 1, kind: input, shape index: {}]   ;;  %s225_s2 = inlined_call_operand.vmem [shape: f32[1,128], index: 2, kind: input, shape index: {}]   ;;  %s226_s3 = inlined_call_operand.hbm [shape: f32[8,128], index: 3, kind: output, shape index: {}]  }
   0x1   :  { %9 = vsyncpa [#allocation6], 0 }
   0x2   :  { %10 = vsyncpa [#allocation4], 0  ;;  %s16_s14 = sshll.u32 %s223_s0, 4  ;;  %s186_s15 = smov [#allocation2]   ;;  %s17_s14 = int_to_ptr.hbm [resolvable:$true] %s16_s14 }
   0x3   :  { %s18_s16 = sshll.u32 %s186_s15, 4  ;;  %s26_s19 = sshll.u32 %s224_s1, 4  ;;  %s19_s16 = int_to_ptr.vmem [resolvable:$true] %s18_s16  ;;  %s27_s19 = int_to_ptr.hbm [resolvable:$true] %s26_s19 }
   0x4   :  { %21 = dma.hbm_to_vmem [thread:$0]  %s17_s14, 128, %s19_s16, [#allocation3]  }
   0x5   :  { %s187_s20 = smov [#allocation5]   ;;  %s188_s22 = smov 128  }
   0x6   :  { %s28_s21 = sshll.u32 %s187_s20, 4  ;;  %s189_s23 = smov 8   ;;  %s29_s21 = int_to_ptr.vmem [resolvable:$true] %s28_s21 }
   0x7   :  { %34 = dma.hbm_to_vmem [thread:$0]  %s27_s19, 512, %s29_s21, [#allocation6], %s188_s22, %s188_s22, %s189_s23  }
   0x8   :  { %180 = dma.done.wait [#allocation3], 128  }
   0x9   :  { %181 = vsyncadd [#allocation3], 4294967168 }
   0xa   :  { %182 = dma.done.wait [#allocation6], 512  }
   0xb   :  { %183 = vsyncadd [#allocation6], 4294966784  ;;  %v49_v0 = vld [vmem:[#allocation5 + $0x18] sm:$0xff]  ;;  %v48_v1 = vld [vmem:[#allocation5 + $0x10] sm:$0xff]  ;;  %vm54_vm0 = vcmask 261120   ;;  %s190_s24 = smov [#allocation7]  }
   0xc   :  { %70 = vmatpush.msra.mxu0 %v49_v0  ;;  %v47_v2 = vld [vmem:[#allocation5 + $0x8] sm:$0xff]  ;;  %v46_v3 = vld [vmem:[#allocation5] sm:$0xff]  ;;  %v45_v4 = vld [vmem:[#allocation2] sm:$0xff]  ;;  %s86_s25 = sshll.u32 %s190_s24, 4  ;;  %s88_s28 = sshll.u32 %s226_s3, 4  ;;  %s87_s25 = int_to_ptr.vmem [resolvable:$true] %s86_s25  ;;  %s89_s28 = int_to_ptr.hbm [resolvable:$true] %s88_s28 }
   0xd   :  { %v105_v5 = vld [vmem:[%s225_s2] ss:$0 sm:$0xff] }
   0xe   :  { %71 = vmatpush.msra.mxu0 %v48_v1 }
  0x10   :  { %72 = vmatpush.msra.mxu0 %v47_v2 }
  0x12   :  { %73 = vmatpush.msra.mxu0 %v46_v3 }
  0x13   :  { %99 = vmatmul.msk.f32.vlgmr.msra.gmra.mxu0 %vm54_vm0, %v45_v4 }
  0x90   :  { %v75_v6 = vpop.f32.mrf.mxu0 }
  0x91   :  { %v76_v7 = vadd.f32 %v105_v5, %v75_v6 }
  0x93   :  { %v78_v8 = vmul.f32 1.442695, %v76_v7 }
  0x95   :  { %106 = vpow2.f32 %v78_v8 }
  0x9b   :  { %v107_v9 = vpop.eup %106 }
  0x9c   :  { %80 = vst [vmem:[#allocation7] sm:$0xff] %v107_v9 }
  0x9d   :  { %91 = dma.vmem_to_hbm [thread:$0]  %s87_s25, 128, %s89_s28, [#allocation4]  }
  0x9e   :  { %184 = dma.done.wait [#allocation4], 128  }
  0x9f   :  { %185 = vsyncadd [#allocation4], 4294967168 }
  0xa0   :  { %96 = vsyncpa [#allocation3], 1 }
  0xa1   :  { %97 = vsyncpa [#allocation6], 1 }
  0xa2   :  { %98 = vsyncpa [#allocation4], 1 }

</bundles_post_ra>
